<compile_context>
chip_gen: v7x
topology: tpu7x:2x2x1
jax: 0.10.0
libtpu: 0.0.40
codegen_flags: <defaults>
</compile_context>

<pallas_src>
import functools

import jax
import jax.numpy as jnp
from jax import lax
from jax.experimental import pallas as pl
from jax.experimental.pallas import tpu as pltpu


def _block_kernel(x_ref, w_ref, shift_ref, o_ref, *, stride, dilation, num_lt):
    """One (batch row, length tile) grid step: k tap dots + shift + ReLU.

    x_ref:     (Cin, L_pad)   bf16  full input row (resident across tiles)
    w_ref:     (k, Cout, Cin) bf16  conv weights with BN scale folded in
    shift_ref: (Cout, 1)      f32   folded BN shift (incl. conv bias)
    o_ref:     (Cout, TL)     bf16  output tile
    """
    k = w_ref.shape[0]
    cin = x_ref.shape[0]
    cout, tl = o_ref.shape
    rf = dilation * (k - 1) + 1          # conv receptive field
    wlen = (tl - 1) * stride + rf        # input span feeding this output tile

    if num_lt == 1:
        start = 0                        # single tile -> fully static slicing
    else:
        # TL is a multiple of 128 when tiled -> vreg-aligned dynamic window.
        start = pl.multiple_of(pl.program_id(1) * (tl * stride), 128)
    window = x_ref[:, pl.ds(start, wlen)]                    # (Cin, wlen)

    acc = jnp.zeros((cout, tl), jnp.float32)
    for t in range(k):                   # k is small (3): static unroll
        lo = t * dilation
        if stride == 1:
            tap = window[:, lo:lo + tl]                       # (Cin, TL)
        else:
            tap = lax.slice(window, (0, lo),
                            (cin, lo + (tl - 1) * stride + 1), (1, stride))
        acc = acc + jnp.dot(w_ref[t], tap, preferred_element_type=jnp.float32)

    o_ref[...] = jnp.maximum(acc + shift_ref[...], 0.0).astype(o_ref.dtype)


def block_forward(x_ncl, params, *, num_ins, num_outs, kernel_size=3,
                  stride=1, dilation=1, eps=1e-5, max_len_tile=8192,
                  compute_dtype=jnp.bfloat16, out_dtype=jnp.bfloat16):
    """relu(bn(conv1d(x))) for x in PyTorch NCL layout; returns NCL out_dtype."""
    N, Cin, L = x_ncl.shape
    assert Cin == num_ins
    k = int(kernel_size)
    rf = dilation * (k - 1) + 1
    L_out = (L - rf) // stride + 1
    assert L_out > 0, "input shorter than the conv receptive field"

    # ---- length tiling (lane axis): one full-length tile when short,
    # otherwise 128-aligned tiles (partial last output block is clipped by
    # Pallas on writeback). ----
    if L_out <= max_len_tile:
        tl, num_lt = L_out, 1
    else:
        assert max_len_tile % 128 == 0
        tl, num_lt = max_len_tile, pl.cdiv(L_out, max_len_tile)

    # Pad the row tail (bf16, only when tiled & ragged) so the last tile's
    # input window stays in bounds; outputs computed from the zero pad land
    # in the dropped part of the partial last output block.
    x = x_ncl.astype(compute_dtype)
    L_need = (num_lt * tl - 1) * stride + rf
    if L_need > L:
        x = jnp.pad(x, ((0, 0), (0, 0), (0, L_need - L)))
    L_pad = x.shape[2]

    # ---- fold eval-mode BN into the conv: scale -> weights, shift -> bias ----
    scale = (params["bn_g"].astype(jnp.float32)
             / jnp.sqrt(params["bn_v"].astype(jnp.float32) + eps))       # (Cout,)
    w = params["conv_w"].astype(jnp.float32) * scale[:, None, None]      # (Cout,Cin,k)
    w_taps = jnp.transpose(w, (2, 0, 1)).astype(compute_dtype)           # (k,Cout,Cin)
    shift = ((params["conv_b"].astype(jnp.float32)
              - params["bn_m"].astype(jnp.float32)) * scale
             + params["bn_b"].astype(jnp.float32)).reshape(num_outs, 1)

    kernel = functools.partial(_block_kernel, stride=stride,
                               dilation=dilation, num_lt=num_lt)
    return pl.pallas_call(
        kernel,
        out_shape=jax.ShapeDtypeStruct((N, num_outs, L_out), out_dtype),
        grid=(N, num_lt),
        in_specs=[
            # Full row; same block for every length tile -> DMA'd once per row.
            pl.BlockSpec((None, Cin, L_pad), lambda n, j: (n, 0, 0)),
            pl.BlockSpec((k, num_outs, Cin), lambda n, j: (0, 0, 0)),
            pl.BlockSpec((num_outs, 1), lambda n, j: (0, 0)),
        ],
        out_specs=pl.BlockSpec((None, num_outs, tl), lambda n, j: (n, 0, j)),
        compiler_params=pltpu.CompilerParams(
            dimension_semantics=("parallel", "parallel"),
            vmem_limit_bytes=32 * 1024 * 1024,   # safe headroom on v7x (64 MiB)
        ),
    )(x, w_taps, shift)


# ---------------- pure-JAX reference (for verification only) ----------------
def block_reference(x, params, *, stride=1, dilation=1, eps=1e-5):
    y = lax.conv_general_dilated(
        x, params["conv_w"], window_strides=(stride,), padding=[(0, 0)],
        rhs_dilation=(dilation,), dimension_numbers=("NCH", "OIH", "NCH"))
    y = y + params["conv_b"][None, :, None]
    y = ((y - params["bn_m"][None, :, None])
         / jnp.sqrt(params["bn_v"][None, :, None] + eps)
         * params["bn_g"][None, :, None] + params["bn_b"][None, :, None])
    return jax.nn.relu(y)


def init_params(key, num_ins, num_outs, k):
    ks = jax.random.split(key, 6)
    p = {
        "conv_w": 0.2 * jax.random.normal(ks[0], (num_outs, num_ins, k)),
        "conv_b": 0.1 * jax.random.normal(ks[1], (num_outs,)),
        "bn_g": 1.0 + 0.1 * jax.random.normal(ks[2], (num_outs,)),
        "bn_b": 0.1 * jax.random.normal(ks[3], (num_outs,)),
        "bn_m": 0.1 * jax.random.normal(ks[4], (num_outs,)),
        "bn_v": jax.random.uniform(ks[5], (num_outs,), minval=0.5, maxval=1.5),
    }
    return jax.tree_util.tree_map(lambda a: a.astype(jnp.float32), p)


def _check(out, x, params, *, stride, dilation, eps=1e-5):
    out_f32 = out.astype(jnp.float32)
    # Tight check: reference fed the same bf16-rounded folded weights / input
    # (kernel accumulates in f32; remaining gap = final bf16 output rounding).
    scale = params["bn_g"] / jnp.sqrt(params["bn_v"] + eps)
    w_fold = (params["conv_w"] * scale[:, None, None]
              ).astype(jnp.bfloat16).astype(jnp.float32)
    shift = (params["conv_b"] - params["bn_m"]) * scale + params["bn_b"]
    x_bf = x.astype(jnp.bfloat16).astype(jnp.float32)
    y = lax.conv_general_dilated(
        x_bf, w_fold, window_strides=(stride,), padding=[(0, 0)],
        rhs_dilation=(dilation,), dimension_numbers=("NCH", "OIH", "NCH"))
    ref_tight = jax.nn.relu(y + shift[None, :, None])
    err = float(jnp.max(jnp.abs(out_f32 - ref_tight)))
    assert jnp.allclose(out_f32, ref_tight, atol=3e-2, rtol=3e-2), err
    # Loose check: full-f32 reference (gap = bf16 operand/output rounding).
    ref = block_reference(x, params, stride=stride, dilation=dilation, eps=eps)
    err = float(jnp.max(jnp.abs(out_f32 - ref)))
    assert jnp.allclose(out_f32, ref, atol=1e-1, rtol=1e-1), err


if __name__ == "__main__":
    num_ins, num_outs, k = 4, 8, 3
    key = jax.random.PRNGKey(0)
    kx1, kx2, kx3, kp = jax.random.split(key, 4)
    params = init_params(kp, num_ins, num_outs, k)

    # --- 1) module demo shape: batch=2, channels=4, length=16 (single tile) ---
    N, L = 2, 16
    x = jax.random.normal(kx1, (N, num_ins, L), dtype=jnp.float32)   # NCL like PyTorch
    out = block_forward(x, params, num_ins=num_ins, num_outs=num_outs,
                        kernel_size=k, stride=1, dilation=1)
    out = jax.block_until_ready(out)
    L_out1 = (L - (k - 1) - 1) + 1
    assert out.shape == (N, num_outs, L_out1)
    assert out.dtype == jnp.bfloat16
    _check(out, x, params, stride=1, dilation=1)

    # --- 2) tiled path: two 128-wide length tiles (L_out = 256), grid (2,2) ---
    L2 = 258
    x2 = jax.random.normal(kx2, (2, num_ins, L2), dtype=jnp.float32)
    out2 = block_forward(x2, params, num_ins=num_ins, num_outs=num_outs,
                         kernel_size=k, stride=1, dilation=1, max_len_tile=128)
    out2 = jax.block_until_ready(out2)
    assert out2.shape == (2, num_outs, 256)
    _check(out2, x2, params, stride=1, dilation=1)

    # --- 3) dilated conv path (dilation=2) ---
    L3 = 24
    x3 = jax.random.normal(kx3, (2, num_ins, L3), dtype=jnp.float32)
    out3 = block_forward(x3, params, num_ins=num_ins, num_outs=num_outs,
                         kernel_size=k, stride=1, dilation=2)
    out3 = jax.block_until_ready(out3)
    assert out3.shape == (2, num_outs, (L3 - 2 * (k - 1) - 1) + 1)
    _check(out3, x3, params, stride=1, dilation=2)

    print("KERNEL_OK")
</pallas_src>

<mosaic_0001>
module attributes {stable_mosaic.version = 11 : i64} {
  func.func @_block_kernel(%arg0: i32, %arg1: i32, %arg2: memref<1x4x16xbf16, #tpu.memory_space<vmem>>, %arg3: memref<3x8x4xbf16, #tpu.memory_space<vmem>>, %arg4: memref<8x1xf32, #tpu.memory_space<vmem>>, %arg5: memref<1x8x14xbf16, #tpu.memory_space<vmem>>) attributes {dimension_semantics = [#tpu.dimension_semantics<parallel>, #tpu.dimension_semantics<parallel>], iteration_bounds = array<i64: 2, 1>, scalar_prefetch = 0 : i64, scratch_operands = 0 : i64, tpu.core_type = #tpu.core_type<tc>, window_params = [{transform_indices = @transform_0, window_bounds = array<i64: 1, 4, 16>}, {pipeline_mode = #tpu.pipeline_mode<synchronous>, transform_indices = @transform_1, window_bounds = array<i64: 3, 8, 4>}, {pipeline_mode = #tpu.pipeline_mode<synchronous>, transform_indices = @transform_2, window_bounds = array<i64: 8, 1>}, {transform_indices = @transform_3, window_bounds = array<i64: 1, 8, 14>}]} {
    %c0 = arith.constant 0 : index
    %c0_0 = arith.constant 0 : index
    %c0_1 = arith.constant 0 : index
    %0 = vector.load %arg2[%c0, %c0_0, %c0_1] : memref<1x4x16xbf16, #tpu.memory_space<vmem>>, vector<1x4x16xbf16>
    %1 = vector.shape_cast %0 : vector<1x4x16xbf16> to vector<4x16xbf16>
    %cst = arith.constant 0.000000e+00 : f32
    %2 = vector.broadcast %cst : f32 to vector<8x14xf32>
    %3 = vector.extract_strided_slice %1 {offsets = [0, 0], sizes = [4, 14], strides = [1, 1]} : vector<4x16xbf16> to vector<4x14xbf16>
    %c0_2 = arith.constant 0 : index
    %c0_3 = arith.constant 0 : index
    %c0_4 = arith.constant 0 : index
    %4 = vector.load %arg3[%c0_2, %c0_3, %c0_4] : memref<3x8x4xbf16, #tpu.memory_space<vmem>>, vector<1x8x4xbf16>
    %5 = vector.shape_cast %4 : vector<1x8x4xbf16> to vector<8x4xbf16>
    %cst_5 = arith.constant dense<0.000000e+00> : vector<8x14xf32>
    %6 = tpu.matmul %5, %3, %cst_5 {dimension_numbers = #tpu.dot_dimension_numbers<[1], [0], [0], [1], [0, 0, 1, 1], [], []>} : vector<8x4xbf16>, vector<4x14xbf16>, vector<8x14xf32> -> vector<8x14xf32>
    %7 = arith.addf %2, %6 : vector<8x14xf32>
    %8 = vector.extract_strided_slice %1 {offsets = [0, 1], sizes = [4, 14], strides = [1, 1]} : vector<4x16xbf16> to vector<4x14xbf16>
    %c1 = arith.constant 1 : index
    %c0_6 = arith.constant 0 : index
    %c0_7 = arith.constant 0 : index
    %9 = vector.load %arg3[%c1, %c0_6, %c0_7] : memref<3x8x4xbf16, #tpu.memory_space<vmem>>, vector<1x8x4xbf16>
    %10 = vector.shape_cast %9 : vector<1x8x4xbf16> to vector<8x4xbf16>
    %cst_8 = arith.constant dense<0.000000e+00> : vector<8x14xf32>
    %11 = tpu.matmul %10, %8, %cst_8 {dimension_numbers = #tpu.dot_dimension_numbers<[1], [0], [0], [1], [0, 0, 1, 1], [], []>} : vector<8x4xbf16>, vector<4x14xbf16>, vector<8x14xf32> -> vector<8x14xf32>
    %12 = arith.addf %7, %11 : vector<8x14xf32>
    %13 = vector.extract_strided_slice %1 {offsets = [0, 2], sizes = [4, 14], strides = [1, 1]} : vector<4x16xbf16> to vector<4x14xbf16>
    %c2 = arith.constant 2 : index
    %c0_9 = arith.constant 0 : index
    %c0_10 = arith.constant 0 : index
    %14 = vector.load %arg3[%c2, %c0_9, %c0_10] : memref<3x8x4xbf16, #tpu.memory_space<vmem>>, vector<1x8x4xbf16>
    %15 = vector.shape_cast %14 : vector<1x8x4xbf16> to vector<8x4xbf16>
    %cst_11 = arith.constant dense<0.000000e+00> : vector<8x14xf32>
    %16 = tpu.matmul %15, %13, %cst_11 {dimension_numbers = #tpu.dot_dimension_numbers<[1], [0], [0], [1], [0, 0, 1, 1], [], []>} : vector<8x4xbf16>, vector<4x14xbf16>, vector<8x14xf32> -> vector<8x14xf32>
    %17 = arith.addf %12, %16 : vector<8x14xf32>
    %c0_12 = arith.constant 0 : index
    %c0_13 = arith.constant 0 : index
    %18 = vector.load %arg4[%c0_12, %c0_13] : memref<8x1xf32, #tpu.memory_space<vmem>>, vector<8x1xf32>
    %19 = vector.broadcast %18 : vector<8x1xf32> to vector<8x14xf32>
    %20 = arith.addf %17, %19 : vector<8x14xf32>
    %cst_14 = arith.constant 0.000000e+00 : f32
    %21 = vector.broadcast %cst_14 : f32 to vector<8x14xf32>
    %22 = arith.maximumf %20, %21 : vector<8x14xf32>
    %23 = arith.truncf %22 : vector<8x14xf32> to vector<8x14xbf16>
    %c0_15 = arith.constant 0 : index
    %c0_16 = arith.constant 0 : index
    %c0_17 = arith.constant 0 : index
    %24 = vector.load %arg5[%c0_15, %c0_16, %c0_17] : memref<1x8x14xbf16, #tpu.memory_space<vmem>>, vector<1x8x14xbf16>
    %25 = vector.shape_cast %24 : vector<1x8x14xbf16> to vector<8x14xbf16>
    %26 = vector.shape_cast %23 : vector<8x14xbf16> to vector<1x8x14xbf16>
    tpu.vector_store %arg5[%c0_15, %c0_16, %c0_17], %26 {strides = array<i32>} : memref<1x8x14xbf16, #tpu.memory_space<vmem>>, vector<1x8x14xbf16>,
    return
  }
  func.func @transform_0(%arg0: i32, %arg1: i32) -> (i32, i32, i32) {
    %c0_i32 = arith.constant 0 : i32
    %c0_i32_0 = arith.constant 0 : i32
    %c0_i32_1 = arith.constant 0 : i32
    return %arg0, %c0_i32, %c0_i32_0 : i32, i32, i32
  }
  func.func @transform_1(%arg0: i32, %arg1: i32) -> (i32, i32, i32) {
    %c0_i32 = arith.constant 0 : i32
    %c0_i32_0 = arith.constant 0 : i32
    %c0_i32_1 = arith.constant 0 : i32
    %c0_i32_2 = arith.constant 0 : i32
    return %c0_i32, %c0_i32_0, %c0_i32_1 : i32, i32, i32
  }
  func.func @transform_2(%arg0: i32, %arg1: i32) -> (i32, i32) {
    %c0_i32 = arith.constant 0 : i32
    %c0_i32_0 = arith.constant 0 : i32
    %c0_i32_1 = arith.constant 0 : i32
    return %c0_i32, %c0_i32_0 : i32, i32
  }
  func.func @transform_3(%arg0: i32, %arg1: i32) -> (i32, i32, i32) {
    %c0_i32 = arith.constant 0 : i32
    %c0_i32_0 = arith.constant 0 : i32
    return %arg0, %c0_i32, %arg1 : i32, i32, i32
  }
}

</mosaic_0001>

<bundles_post_ra>
// kernel: tpu_custom_call.1
= control target key start
LH: loop header
LB: loop body
LE: loop exit
PB: predicated region body
PF: predicated region fallthrough
CT: control target
= control target key end

     0   :  { %8 = vsyncpa [#allocation3], 0  ;;  %s777_s0 = inlined_call_operand.vmem [shape: bf16[2,4,16], index: 0, kind: input, shape index: {}]   ;;  %s778_s1 = inlined_call_operand.vmem [shape: bf16[3,8,4], index: 1, kind: input, shape index: {}]   ;;  %s779_s2 = inlined_call_operand.vmem [shape: f32[8,1], index: 2, kind: input, shape index: {}]   ;;  %s780_s3 = inlined_call_operand.hbm [shape: bf16[2,8,14], index: 3, kind: output, shape index: {}]  }
   0x1   :  { %10 = vsyncpa [#allocation3 + $0x1], 0  ;;  %s644_s12 = smov 0   ;;  %s646_s13 = smov 0  }
   0x2   :  { %s648_s14 = smov 0   ;;  %s650_s15 = smov 0  }
   0x3   :  { %s652_s16 = smov 0   ;;  %s654_s17 = smov 0  }
   0x4 LB: > { %s434_s18 = sadd.s32 4294967295, %s615_s17   ;;  %s435_s19 = sadd.s32 4294967294, %s615_s17   ;;  %s615_s17 = sphi %s654_s17, %s16_s17   ;;  %s611_s16 = sphi %s652_s16, %s787_s16   ;;  %s607_s15 = sphi %s650_s15, %s786_s15   ;;  %s603_s14 = sphi %s648_s14, %s785_s14   ;;  %s599_s13 = sphi %s646_s13, %s784_s13   ;;  %s595_s12 = sphi %s644_s12, %s783_s12  }
   0x5   : > { %s28_s20 = sadd.s32 1, %s611_s16  ;;  %s105_s21 = sadd.s32 1, %s603_s14 }
   0x6   : > { %p30_p0 = scmp.ge.s32.totalorder %s28_s20, 2  ;;  %p115_p1 = scmp.ne.s32.totalorder %s603_s14, %s599_s13 }
   0x7   : > { %p116_p2 = scmp.eq.s32.totalorder %s434_s18, 1  ;;  %p121_p3 = scmp.ne.s32.totalorder %s599_s13, %s595_s12 }
   0x8   : > { %s789_s20 = smov (%p30_p0, %s28_s20), 0  ;;  %p122_p5 = scmp.eq.s32.totalorder %s435_s19, 1 }
   0x9   : > { %p684_p4 = por %p116_p2, %p115_p1  ;;  %s100_s23 = ssub.s32 %s611_s16, %s789_s20 }
   0xa   : > { %p438_p6 = scmp.ge.s32.totalorder %s615_s17, 1  ;;  %p103_p7 = scmp.eq.s32.totalorder %s100_s23, 0 }
   0xb   : > { %p691_p8 = por %p122_p5, %p121_p3  ;;  %p153_p9 = scmp.lt.s32.totalorder %s615_s17, 3 }
   0xc   : > { %s697_s25 = scalar_select %p103_p7, %s603_s14, %s105_s21  }
   0xd   : > { %p154_p10 = pnand %p438_p6, %p153_p9 }
   0xe   : > { %p176_p11 = scmp.lt.s32.totalorder (!%p154_p10), %s607_s15, 1  ;;  %v189_v0 = vlaneseq (!%p154_p10)  ;;  %v617_v1 = vmov (!%p154_p10), 1983009808   ;;  %v618_v3 = vmov (!%p154_p10), 0.0   ;;  %vm619_vm0 = vmmov (!%p154_p10), 0   ;;  %v340_v11 = vld [vmem:[%s779_s2] sm:$0xff] (!%p154_p10) }
   0xf   : > { %157 = sbr.rel (%p154_p10) target bundleno = 390 (0x186), region = 32  ;;  %v187_v2 = vunpack.c.l.s4 (!%p154_p10), %v617_v1  ;;  %456 = vmatprep.subr.bf16.mxu0 (!%p154_p10), %v618_v3  ;;  %462 = vmatprep.subr.bf16.mxu1 (!%p154_p10), %v618_v3  ;;  %vm199_vm1 = vcmask (!%p154_p10), 1041408   ;;  %vm195_vm2 = vcmask (!%p154_p10), 31744   ;;  %v182_v10 = vld [vmem:[%s778_s1] sm:$0xf] (!%p154_p10)  ;;  %s620_s8 = smov (!%p154_p10), 127  }
  0x10   : > { %v190_v4 = vshrl.u32 (!%p154_p10), %v189_v0, 7  ;;  %458 = vmatprep.mubr.msk.bf16.mxu0 (!%p154_p10), %vm619_vm0, %v618_v3  ;;  %464 = vmatprep.mubr.msk.bf16.mxu1 (!%p154_p10), %vm619_vm0, %v618_v3  ;;  %v621_v12 = vmov (!%p154_p10), 0   ;;  %s622_s9 = smov (!%p154_p10), 126   ;;  %v441_v15 = vld [vmem:[%s778_s1 + $0x4] sm:$0xf] (!%p154_p10)  ;;  %s173_s21 = sand.u32 (!%p154_p10), 1, %s599_s13  }
  0x11   : > { %v188_v5 = vunpack.c.0.s8 (!%p154_p10), %v187_v2  ;;  %535 = vset.pattern.permute.xlu1 (!%p154_p10), %v621_v12  ;;  %536 = vset.pattern.permute.xlu0 (!%p154_p10), %v621_v12  ;;  %v444_v18 = vld [vmem:[%s778_s1 + $0x8] sm:$0xf] (!%p154_p10)  ;;  %s439_s23 = sshll.u32 (!%p154_p10), %s173_s21, 2  ;;  %vm349_vm3 = vcmask (!%p154_p10), 109568   ;;  %s352_s5 = scalar_lea.sflag (!%p154_p10), [#allocation3], %s173_s21 }
  0x12   : > { %343 = vperm.xlu1 (!%p154_p10), %535, %v340_v11  }
  0x13   : > { %v191_v6 = vsub.s32 (!%p154_p10), %v188_v5, %v190_v4 }
  0x16   : > { %s177_s26 = scalar_select %p176_p11, %s607_s15, 1 }
  0x18   : > { %s440_s27 = sshll.u32 %s177_s26, 1  ;;  %s447_s26 = sshll.u32 %s607_s15, 6 }
  0x19   : > { %s179_s30 = scalar_lea.vmem %s777_s0, %s440_s27  ;;  %s175_s27 = scalar_lea.vmem [#allocation2], %s439_s23 }
  0x1a   : > { %v181_v7 = vld [vmem:[%s179_s30] sm:$0x3]  ;;  %s366_s28 = sshll.u32 %s175_s27, 4  ;;  %s730_s4 = scalar_lea.hbm %s780_s3, %s447_s26  ;;  %s732_s28 = int_to_ptr.vmem [resolvable:$true] %s366_s28 }
  0x1b   : > { %v192_v8 = vrot.slane %v181_v7, %v191_v6  ;;  %v247_v9 = vsel %vm199_vm1, %v181_v7, 0  ;;  %s537_s6 = scalar_lea.vmem %s732_s28, 64  ;;  %s623_s15 = smov [#allocation2]  }
  0x1c   : > { %463 = vmatpush3.bf16.msra.mxu1 %v247_v9  ;;  %p538_p12 = scmp.ne.s32.totalorder %s732_s28, %s537_s6  ;;  %s541_s7 = sshll.u32 %s623_s15, 4  ;;  %s542_s7 = int_to_ptr.vmem [resolvable:$false] %s541_s7 }
  0x1d   : > { %193 = vrot.lane.b32.xlu0 %v192_v8, %s620_s8  ;;  %s543_s8 = scalar_lea.vmem %s542_s7, 128  ;;  %p544_p1 = scmp.lt.s32.totalorder %s732_s28, %s542_s7 }
  0x1e   : > { %p539_p13 = pnand %p538_p12, %p684_p4  ;;  %p545_p2 = scmp.lt.s32.totalorder %s543_s8, %s537_s6 }
  0x1f   : > { %465 = vmatmul.mubr.msk.bf16.vlgmr.msra.gmra.mrb[0].mxu1 %vm195_vm2, %v182_v10 }
  0x20   : > { %p540_p0 = pneg %p539_p13  ;;  %p546_p3 = por %p545_p2, %p544_p1 }
  0x21   : > { %291 = vrot.lane.b32.xlu0 %v192_v8, %s622_s9 }
  0x22   : > { %p547_p5 = pnand %p546_p3, %p540_p0 }
  0x8f   : > { %v194_v13 = vpop.permute.xlu0 %193 }
  0x90   : > { %v201_v14 = vsel %vm199_vm1, %v194_v13, 0 }
  0x91   : > { %457 = vmatpush3.bf16.msra.mxu0 %v201_v14  ;;  %v344_v29 = vpop.permute.xlu1 %343 }
  0x92   : > { %468 = vmatprep.subr.bf16.mxu0 %v618_v3 }
  0x93   : > { %v292_v16 = vpop.permute.xlu0 %291 }
  0x94   : > { %v297_v17 = vsel %vm199_vm1, %v292_v16, 0  ;;  %459 = vmatmul.mubr.msk.bf16.vlgmr.msra.gmra.mrb[0].mxu0 %vm195_vm2, %v441_v15 }
  0x95   : > { %469 = vmatpush3.bf16.msra.mxu0 %v297_v17  ;;  %470 = vmatprep.mubr.msk.bf16.mxu0 %vm619_vm0, %v618_v3 }
  0x9c   : > { %471 = vmatmul.mubr.msk.bf16.vlgmr.msra.gmra.mrb[4].mxu0 %vm195_vm2, %v444_v18 }
  0xf2   : > { %v283_v19 = vpop.f32.mrb[0].mxu1 }
  0xf3   : > { %v466_v20 = vpop.f32.mrb[1].mxu1 }
  0xf4   : > { %v286_v21 = vpop.f32.mrb[2].mxu1 }
  0xf5   : > { %v467_v22 = vpop.f32.mrb[3].mxu1 }
 0x167   : > { %v237_v23 = vpop.f32.mrb[0].mxu0 }
 0x168   : > { %v460_v24 = vpop.f32.mrb[1].mxu0  ;;  %v284_v25 = vadd.f32 %v283_v19, %v237_v23 }
 0x169   : > { %v240_v26 = vpop.f32.mrb[2].mxu0 }
 0x16a   : > { %v461_v27 = vpop.f32.mrb[3].mxu0 }
 0x16f   : > { %v333_v28 = vpop.f32.mrb[4].mxu0 }
 0x170   : > { %v339_v30 = vadd.f32 %v333_v28, %v284_v25  ;;  %v472_v31 = vpop.f32.mrb[5].mxu0 }
 0x171   : > { %v336_v32 = vpop.f32.mrb[6].mxu0 }
 0x172   : > { %v346_v33 = vadd.f32 %v344_v29, %v339_v30  ;;  %v473_v34 = vpop.f32.mrb[7].mxu0 }
 0x174   : > { %v347_v35 = vmax.f32 %v346_v33, 0.0 }
 0x176   : > { %v348_v36 = vpack.c.bf16 %v347_v35, %v347_v35 }
 0x178   : > { %350 = vst.msk [vmem:[%s175_s27] sm:$0xf] %vm349_vm3, %v348_v36 }
 0x179   : > { %550 = shalt.err (!%p547_p5)
}
 0x17a   : > { %s551_s9 = scalar_lea.hbm %s730_s4, 64  ;;  %s555_s18 = scalar_lea.hbm %s780_s3, 128 }
 0x17b   : > { %p552_p6 = scmp.ne.s32.totalorder %s730_s4, %s551_s9  ;;  %p556_p10 = scmp.lt.u32.totalorder %s730_s4, %s780_s3 }
 0x17c   : > { %p557_p11 = scmp.lt.u32.totalorder %s555_s18, %s551_s9  ;;  %p559_p13 = scmp.lt.u32.totalorder %s551_s9, %s730_s4 }
 0x17d   : > { %p553_p7 = pnand %p552_p6, %p684_p4 }
 0x17e   : > { %p558_p12 = por %p557_p11, %p556_p10 }
 0x17f   : > { %p554_p9 = pneg %p553_p7 }
 0x180   : > { %p560_p0 = por %p559_p13, %p558_p12 }
 0x182   : > { %p561_p1 = pnand %p560_p0, %p554_p9 }
 0x184   : > { %564 = shalt.err (!%p561_p1)
}
 0x185   : > { %474 = dma.vmem_to_hbm [thread:$0]  (%p684_p4), %s732_s28, 64, %s730_s4, %s352_s5  }
 0x186 PF: > { %p480_p2 = scmp.ge.s32.totalorder %s615_s17, 2  ;;  %s378_s23 = sand.u32 1, %s595_s12  }
 0x187   : > { %s379_s26 = scalar_lea.sflag [#allocation3], %s378_s23 }
 0x188   : > { %p477_p3 = pnand %p480_p2, %p691_p8 }
 0x18a   : > { %590 = dma.done.wait (!%p477_p3), %s379_s26, 64  }
 0x18b   : > { %592 = vsyncadd (!%p477_p3), %s379_s26, 4294967232  ;;  %s16_s17 = sadd.s32 1, %s615_s17   ;;  %s783_s12 = smov %s599_s13 }
 0x18c   : > { %p13_p5 = scmp.ge.s32.totalorder %s16_s17, 4   ;;  %s784_s13 = smov %s603_s14 }
 0x18d   : > { %s785_s14 = smov %s697_s25  ;;  %s786_s15 = smov %s611_s16 }
 0x18e   : > { %s787_s16 = smov %s789_s20  ;;  %15 = sbr.rel (!%p13_p5) target bundleno = 4 (0x4), region = 69 }
 0x195   :  { %384 = vsyncpa [#allocation3], 1 }
 0x196   :  { %386 = vsyncpa [#allocation3 + $0x1], 1 }

</bundles_post_ra>
